<compile_context>
chip_gen: v5e
topology: v5e:2x2
jax: 0.10.0
libtpu: 0.0.40
codegen_flags: <defaults>
</compile_context>

<pallas_src>
import math

import jax
import jax.numpy as jnp
from jax.experimental import pallas as pl
from jax.experimental.pallas import tpu as pltpu

LANE = 128   # vreg lane width  -> output last-dim alignment (unmasked stores)
SUB = 8      # vreg sublane width


def _round_up(x, m):
    return ((x + m - 1) // m) * m


def _matmul_bias_kernel(x_ref, w_ref, b_ref, o_ref, acc_ref):
    k = pl.program_id(2)

    @pl.when(k == 0)
    def _():
        acc_ref[...] = jnp.zeros_like(acc_ref)

    acc_ref[...] += jnp.dot(x_ref[...], w_ref[...],
                            preferred_element_type=jnp.float32)

    @pl.when(k == pl.num_programs(2) - 1)
    def _():
        o_ref[...] = (acc_ref[...] + b_ref[...]).astype(o_ref.dtype)


def _matmul_kernel(x_ref, w_ref, o_ref, acc_ref):
    k = pl.program_id(2)

    @pl.when(k == 0)
    def _():
        acc_ref[...] = jnp.zeros_like(acc_ref)

    acc_ref[...] += jnp.dot(x_ref[...], w_ref[...],
                            preferred_element_type=jnp.float32)

    @pl.when(k == pl.num_programs(2) - 1)
    def _():
        o_ref[...] = acc_ref[...].astype(o_ref.dtype)


def customized_linear_forward(x, weight, mask=None, bias=None, *,
                              row_tile=None, col_tile=None, k_tile=None,
                              compute_dtype=jnp.bfloat16):
    """Pallas implementation of CustomizedLinearFunction.forward.

    x:      [N, K]   where K = weight.shape[0] (the module's output_features)
    weight: [K, M]   module's stored layout (output_features, input_features)
    mask:   [K, M]   module's stored (transposed) 0/1 connectivity mask, or None
    bias:   [M] or None
    returns [N, M] = x @ (weight * mask) (+ bias), dtype of x.
    """
    N, K = x.shape
    Kw, M = weight.shape
    assert Kw == K
    if mask is not None:
        assert mask.shape == (K, M)
    if bias is not None:
        assert bias.shape == (M,)
    out_dtype = x.dtype

    # Forward-time masking is grid-invariant -> hoist out of the kernel body.
    # XLA fuses this multiply with the cast/pad below; no mask DMA / VMEM.
    wm = weight if mask is None else weight * mask

    # --- tile sizes ---------------------------------------------------------
    if row_tile is None:
        if N >= 1024:
            row_tile = 512
        elif N > 2 * SUB:
            # >=2 parallel row steps when rows allow (v7x megacore).
            row_tile = _round_up((N + 1) // 2, SUB)
        else:
            row_tile = SUB
    row_tile = max(SUB, _round_up(row_tile, SUB))
    n_pad = _round_up(N, row_tile)

    if col_tile is None:
        col_tile = min(512, _round_up(M, LANE))   # lane-dense, bounds weight VMEM
    col_tile = _round_up(col_tile, LANE)
    m_pad = _round_up(M, col_tile)

    if k_tile is None:
        k_tile = K if K <= 2048 else 512          # tile the contraction only when large
    if k_tile != K:
        k_tile = _round_up(k_tile, LANE)
    k_pad = _round_up(K, k_tile)

    # --- cast + zero-pad once in the wrapper (zero padding is inert) ---------
    xp = x.astype(compute_dtype)
    if (n_pad, k_pad) != (N, K):
        xp = jnp.pad(xp, ((0, n_pad - N), (0, k_pad - K)))
    wp = wm.astype(compute_dtype)
    if (k_pad, m_pad) != (K, M):
        wp = jnp.pad(wp, ((0, k_pad - K), (0, m_pad - M)))

    grid = (n_pad // row_tile, m_pad // col_tile, k_pad // k_tile)

    x_spec = pl.BlockSpec((row_tile, k_tile), lambda i, j, k: (i, k))
    w_spec = pl.BlockSpec((k_tile, col_tile), lambda i, j, k: (k, j))
    o_spec = pl.BlockSpec((row_tile, col_tile), lambda i, j, k: (i, j))
    out_shape = jax.ShapeDtypeStruct((n_pad, m_pad), out_dtype)
    scratch = [pltpu.VMEM((row_tile, col_tile), jnp.float32)]

    # VMEM budget: double-buffered blocks + f32 accumulator + headroom.
    ci = jnp.dtype(compute_dtype).itemsize
    oi = jnp.dtype(out_dtype).itemsize
    per_step = (row_tile * k_tile * ci           # x block
                + k_tile * col_tile * ci         # weight block
                + col_tile * 4                   # bias row (f32)
                + row_tile * col_tile * oi)      # output block
    vmem_limit = max(16 << 20,
                     min(64 << 20,
                         int(2 * per_step * 1.25)
                         + row_tile * col_tile * 4 + (2 << 20)))
    params = pltpu.CompilerParams(
        dimension_semantics=("parallel", "parallel", "arbitrary"),
        vmem_limit_bytes=vmem_limit)

    if bias is None:
        out = pl.pallas_call(
            _matmul_kernel,
            out_shape=out_shape,
            grid=grid,
            in_specs=[x_spec, w_spec],
            out_specs=o_spec,
            scratch_shapes=scratch,
            compiler_params=params,
        )(xp, wp)
    else:
        bp = bias.astype(jnp.float32)
        if m_pad != M:
            bp = jnp.pad(bp, (0, m_pad - M))
        bp = bp.reshape(1, m_pad)
        b_spec = pl.BlockSpec((1, col_tile), lambda i, j, k: (0, j))
        out = pl.pallas_call(
            _matmul_bias_kernel,
            out_shape=out_shape,
            grid=grid,
            in_specs=[x_spec, w_spec, b_spec],
            out_specs=o_spec,
            scratch_shapes=scratch,
            compiler_params=params,
        )(xp, wp, bp)

    if (n_pad, m_pad) != (N, M):
        out = out[:N, :M]
    return out


def init_customized_linear_params(key, mask_in, bias=True):
    """Mirror CustomizedLinear.__init__ / reset_parameters.

    mask_in: [n_input_feature, n_output_feature] 0/1 connectivity matrix.
    Returns (weight, mask_t, bias) in the module's stored layout:
      weight, mask_t: [n_output_feature, n_input_feature]; bias: [n_out] or None.
    """
    n_in, n_out = mask_in.shape
    mask_t = mask_in.astype(jnp.float32).T
    stdv = 1.0 / math.sqrt(n_in)                    # 1/sqrt(weight.size(1))
    kw, kb = jax.random.split(key)
    weight = jax.random.uniform(kw, (n_out, n_in), jnp.float32, -stdv, stdv)
    weight = weight * mask_t                        # __init__ pre-masks stored weight
    b = jax.random.uniform(kb, (n_out,), jnp.float32, -stdv, stdv) if bias else None
    return weight, mask_t, b


if __name__ == "__main__":
    # Square features (n_input == n_output) so the literal forward
    # (input.mm(stored weight) + bias) is well-formed, as in the module.
    N = 256       # rows -> 2 parallel row-tile steps with the default tiling
    D = 128       # n_input_feature == n_output_feature (lane-aligned)

    key = jax.random.PRNGKey(0)
    kmask, kparams, kx = jax.random.split(key, 3)

    conn = jax.random.bernoulli(kmask, 0.5, (D, D)).astype(jnp.float32)
    weight, mask_t, bias = init_customized_linear_params(kparams, conn, bias=True)
    x = jax.random.normal(kx, (N, D), dtype=jnp.float32)

    # Reference: literal CustomizedLinearFunction.forward math, full precision.
    ref = jnp.dot(x, weight * mask_t, precision=jax.lax.Precision.HIGHEST) + bias[None, :]

    # Default path: bf16 MXU operands, f32 accumulation (looser tolerance).
    out_bf16 = jax.block_until_ready(customized_linear_forward(x, weight, mask_t, bias))
    assert out_bf16.shape == (N, D)
    assert jnp.allclose(out_bf16, ref, atol=3e-2, rtol=3e-2), \
        float(jnp.max(jnp.abs(out_bf16 - ref)))

    # Full-f32 path for a tight numerical check.
    out_f32 = jax.block_until_ready(
        customized_linear_forward(x, weight, mask_t, bias, compute_dtype=jnp.float32))
    assert jnp.allclose(out_f32, ref, atol=5e-4, rtol=5e-4), \
        float(jnp.max(jnp.abs(out_f32 - ref)))

    print("KERNEL_OK")
</pallas_src>

<mosaic_0001>
module attributes {stable_mosaic.version = 11 : i64} {
  func.func @_matmul_bias_kernel(%arg0: i32, %arg1: i32, %arg2: i32, %arg3: memref<128x128xbf16, #tpu.memory_space<vmem>>, %arg4: memref<128x128xbf16, #tpu.memory_space<vmem>>, %arg5: memref<1x128xf32, #tpu.memory_space<vmem>>, %arg6: memref<128x128xf32, #tpu.memory_space<vmem>>, %arg7: memref<128x128xf32, #tpu.memory_space<vmem>>) attributes {dimension_semantics = [#tpu.dimension_semantics<parallel>, #tpu.dimension_semantics<parallel>, #tpu.dimension_semantics<arbitrary>], iteration_bounds = array<i64: 2, 1, 1>, scalar_prefetch = 0 : i64, scratch_operands = 1 : i64, tpu.core_type = #tpu.core_type<tc>, window_params = [{transform_indices = @transform_0, window_bounds = array<i64: 128, 128>}, {transform_indices = @transform_1, window_bounds = array<i64: 128, 128>}, {transform_indices = @transform_2, window_bounds = array<i64: 1, 128>}, {transform_indices = @transform_3, window_bounds = array<i64: 128, 128>}]} {
    %c0_i32 = arith.constant 0 : i32
    %0 = arith.cmpi eq, %arg2, %c0_i32 : i32
    %1 = arith.extui %0 : i1 to i32
    %c0_i32_0 = arith.constant 0 : i32
    %2 = arith.cmpi ne, %1, %c0_i32_0 : i32
    scf.if %2 {
      %cst_10 = arith.constant 0.000000e+00 : f32
      %12 = vector.broadcast %cst_10 : f32 to vector<128x128xf32>
      %c0_11 = arith.constant 0 : index
      %c0_12 = arith.constant 0 : index
      %13 = vector.load %arg7[%c0_11, %c0_12] : memref<128x128xf32, #tpu.memory_space<vmem>>, vector<128x128xf32>
      tpu.vector_store %arg7[%c0_11, %c0_12], %12 {strides = array<i32>} : memref<128x128xf32, #tpu.memory_space<vmem>>, vector<128x128xf32>,
    } else {
    }
    %c0 = arith.constant 0 : index
    %c0_1 = arith.constant 0 : index
    %3 = vector.load %arg7[%c0, %c0_1] : memref<128x128xf32, #tpu.memory_space<vmem>>, vector<128x128xf32>
    %c0_2 = arith.constant 0 : index
    %c0_3 = arith.constant 0 : index
    %4 = vector.load %arg3[%c0_2, %c0_3] : memref<128x128xbf16, #tpu.memory_space<vmem>>, vector<128x128xbf16>
    %c0_4 = arith.constant 0 : index
    %c0_5 = arith.constant 0 : index
    %5 = vector.load %arg4[%c0_4, %c0_5] : memref<128x128xbf16, #tpu.memory_space<vmem>>, vector<128x128xbf16>
    %cst = arith.constant dense<0.000000e+00> : vector<128x128xf32>
    %6 = tpu.matmul %4, %5, %cst {dimension_numbers = #tpu.dot_dimension_numbers<[1], [0], [0], [1], [0, 0, 1, 1], [], []>} : vector<128x128xbf16>, vector<128x128xbf16>, vector<128x128xf32> -> vector<128x128xf32>
    %7 = arith.addf %3, %6 : vector<128x128xf32>
    %c0_6 = arith.constant 0 : index
    %c0_7 = arith.constant 0 : index
    %8 = vector.load %arg7[%c0_6, %c0_7] : memref<128x128xf32, #tpu.memory_space<vmem>>, vector<128x128xf32>
    tpu.vector_store %arg7[%c0_6, %c0_7], %7 {strides = array<i32>} : memref<128x128xf32, #tpu.memory_space<vmem>>, vector<128x128xf32>,
    %c0_i32_8 = arith.constant 0 : i32
    %9 = arith.cmpi eq, %arg2, %c0_i32_8 : i32
    %10 = arith.extui %9 : i1 to i32
    %c0_i32_9 = arith.constant 0 : i32
    %11 = arith.cmpi ne, %10, %c0_i32_9 : i32
    scf.if %11 {
      %c0_10 = arith.constant 0 : index
      %c0_11 = arith.constant 0 : index
      %12 = vector.load %arg7[%c0_10, %c0_11] : memref<128x128xf32, #tpu.memory_space<vmem>>, vector<128x128xf32>
      %c0_12 = arith.constant 0 : index
      %c0_13 = arith.constant 0 : index
      %13 = vector.load %arg5[%c0_12, %c0_13] : memref<1x128xf32, #tpu.memory_space<vmem>>, vector<1x128xf32>
      %14 = vector.broadcast %13 : vector<1x128xf32> to vector<128x128xf32>
      %15 = arith.addf %12, %14 : vector<128x128xf32>
      %c0_14 = arith.constant 0 : index
      %c0_15 = arith.constant 0 : index
      %16 = vector.load %arg6[%c0_14, %c0_15] : memref<128x128xf32, #tpu.memory_space<vmem>>, vector<128x128xf32>
      tpu.vector_store %arg6[%c0_14, %c0_15], %15 {strides = array<i32>} : memref<128x128xf32, #tpu.memory_space<vmem>>, vector<128x128xf32>,
    } else {
    }
    return
  }
  func.func @transform_0(%arg0: i32, %arg1: i32, %arg2: i32) -> (i32, i32) {
    %c0_i32 = arith.constant 0 : i32
    return %arg0, %arg2 : i32, i32
  }
  func.func @transform_1(%arg0: i32, %arg1: i32, %arg2: i32) -> (i32, i32) {
    %c0_i32 = arith.constant 0 : i32
    return %arg2, %arg1 : i32, i32
  }
  func.func @transform_2(%arg0: i32, %arg1: i32, %arg2: i32) -> (i32, i32) {
    %c0_i32 = arith.constant 0 : i32
    %c0_i32_0 = arith.constant 0 : i32
    return %c0_i32, %arg1 : i32, i32
  }
  func.func @transform_3(%arg0: i32, %arg1: i32, %arg2: i32) -> (i32, i32) {
    %c0_i32 = arith.constant 0 : i32
    return %arg0, %arg1 : i32, i32
  }
}

</mosaic_0001>

<bundles_post_ra>
// kernel: tpu_custom_call.1
= control target key start
LH: loop header
LB: loop body
LE: loop exit
PB: predicated region body
PF: predicated region fallthrough
CT: control target
= control target key end

     0   :  { %s1254_s0 = inlined_call_operand.hbm [shape: bf16[256,128], index: 0, kind: input, shape index: {}]   ;;  %s1255_s1 = inlined_call_operand.hbm [shape: bf16[128,128], index: 1, kind: input, shape index: {}]   ;;  %s1256_s2 = inlined_call_operand.vmem [shape: f32[1,128], index: 2, kind: input, shape index: {}]   ;;  %s1257_s3 = inlined_call_operand.hbm [shape: f32[256,128], index: 3, kind: output, shape index: {}]  }
   0x1   :  { %1259 = sst [smem:[#allocation12_spill]] %s1255_s1 }
   0x2   :  { %8 = vsyncpa [#allocation4], 0 }
   0x3   :  { %10 = vsyncpa [#allocation4 + $0x1], 0 }
   0x4   :  { %11 = vsyncpa [#allocation7], 0 }
   0x5   :  { %12 = vsyncpa [#allocation5], 0 }
   0x6   :  { %14 = vsyncpa [#allocation5 + $0x1], 0  ;;  %s1066_s12 = smov 0   ;;  %s1068_s13 = smov 0  }
   0x7   :  { %s1070_s14 = smov 0   ;;  %s1072_s15 = smov 0  }
   0x8   :  { %s1074_s16 = smov 0   ;;  %s1076_s17 = smov 0  }
   0x9 LB: > { %s691_s18 = sadd.s32 4294967295, %s1039_s17   ;;  %s692_s19 = sadd.s32 4294967294, %s1039_s17   ;;  %s1039_s17 = sphi %s1076_s17, %s20_s17   ;;  %s1035_s16 = sphi %s1074_s16, %s1273_s16   ;;  %s1031_s15 = sphi %s1072_s15, %s1272_s15   ;;  %s1027_s14 = sphi %s1070_s14, %s1271_s14   ;;  %s1023_s13 = sphi %s1068_s13, %s1270_s13   ;;  %s1019_s12 = sphi %s1066_s12, %s1269_s12  }
   0xa   : > { %p61_p0 = scmp.ne.s32.totalorder %s1023_s13, %s1019_s12  ;;  %p1100_p1 = scmp.eq.s32.totalorder %s691_s18, 0 }
   0xb   : > { %p1104_p2 = scmp.eq.s32.totalorder %s691_s18, 1  ;;  %p147_p3 = scmp.eq.s32.totalorder %s692_s19, 1 }
   0xc   : > { %p1110_p4 = por %p1100_p1, %p61_p0  ;;  %p693_p5 = scmp.ge.s32.totalorder %s1039_s17, 1 }
   0xd   : > { %p1115_p6 = por %p147_p3, %p61_p0  ;;  %p154_p7 = scmp.lt.s32.totalorder %s1039_s17, 3 }
   0xe   : > { %s1264_s1 = sld [smem:[#allocation12_spill]]  ;;  %s1041_s28 = smov [#allocation6]  }
   0xf   : > { %p1123_p8 = pnand %p693_p5, %p154_p7  ;;  %s171_s29 = sshll.u32 %s1041_s28, 4  ;;  %s172_s29 = int_to_ptr.vmem [resolvable:$true] %s171_s29 }
  0x10   : > { %p696_p11 = scmp.ge.s32.totalorder %s1039_s17, 2  ;;  %s1258_s30 = smov 64  }
  0x11   : > { %p823_p9 = pneg %p1123_p8  ;;  %s1043_s4 = smov 4  }
  0x12   : > { %s39_s5 = sadd.s32 1, %s1035_s16  ;;  %s48_s6 = sadd.s32 1, %s1027_s14 }
  0x13   : > { %p824_p10 = pnand %p823_p9, %p1100_p1  ;;  %p41_p12 = scmp.ge.s32.totalorder %s39_s5, 2 }
  0x14   : > { %s169_s26 = sshll.u32 %s1264_s1, 4  ;;  %p55_p13 = scmp.ne.s32.totalorder %s1027_s14, %s1023_s13  ;;  %s170_s26 = int_to_ptr.hbm [resolvable:$true] %s169_s26 }
  0x15   : > { %826 = dma.hbm_to_vmem [thread:$0]  (!%p824_p10), %s170_s26, 1024, %s172_s29, [#allocation7], %s1258_s30, %s1258_s30, %s1043_s4  }
  0x16   : > { %p56_p0 = scmp.eq.s32.totalorder %s1039_s17, 0  ;;  %s1275_s5 = smov (%p41_p12, %s39_s5), 0 }
  0x17   : > { %p1148_p5 = por %p1104_p2, %p55_p13  ;;  %s43_s9 = ssub.s32 %s1035_s16, %s1275_s5 }
  0x18   : > { %p1142_p3 = por %p56_p0, %p55_p13  ;;  %p836_p7 = scmp.lt.s32.totalorder %s1039_s17, 2 }
  0x19   : > { %p46_p9 = scmp.eq.s32.totalorder %s43_s9, 0  ;;  %s191_s10 = sand.u32 1, %s1027_s14  }
  0x1a   : > { %s697_s11 = sshll.u32 %s191_s10, 6  ;;  %s773_s19 = sshll.u32 %s1035_s16, 6 }
  0x1b   : > { %s1157_s18 = scalar_select %p46_p9, %s1027_s14, %s48_s6  }
  0x1c   : > { %s201_s26 = scalar_lea.hbm %s1254_s0, %s773_s19  ;;  %s195_s28 = scalar_lea.vmem [#allocation3], %s697_s11 }
  0x1d   : > { %s204_s29 = sshll.u32 %s195_s28, 4  ;;  %s202_s21 = sshll.u32 %s201_s26, 4  ;;  %s205_s29 = int_to_ptr.vmem [resolvable:$true] %s204_s29  ;;  %s203_s21 = int_to_ptr.hbm [resolvable:$true] %s202_s21 }
  0x1e   : > { %p828_p2 = pnand %p836_p7, %p1142_p3  ;;  %s192_s30 = scalar_lea.sflag [#allocation4], %s191_s10 }
  0x1f   : > { %s1268_s1 = smov 64   ;;  %216 = sbr.rel (%p1123_p8) target bundleno = 235 (0xeb), region = 32 }
  0x20   : > { %830 = dma.hbm_to_vmem [thread:$0]  (!%p828_p2), %s203_s21, 1024, %s205_s29, %s192_s30, %s1268_s1, %s1268_s1, %s1043_s4  }
  0x21   : > { %s1171_s6 = sand.u32 (!%p1123_p8), 1, %s1023_s13  }
  0x22   : > { %s701_s9 = sshll.u32 (!%p1123_p8), %s1171_s6, 6  ;;  %s219_s11 = scalar_lea.sflag (!%p1123_p8), [#allocation4], %s1171_s6 }
  0x23   : > { %s1175_s19 = scalar_lea.vmem (!%p1123_p8), [#allocation3], %s701_s9 }
  0x24   : > { %1006 = dma.done.wait (%p1110_p4), %s219_s11, 1024  }
  0x25   : > { %1008 = vsyncadd (%p1110_p4), %s219_s11, 4294966272 }
  0x26   : > { %1010 = dma.done.wait (%p1100_p1), [#allocation7], 1024  }
  0x27   : > { %1012 = vsyncadd (%p1100_p1), [#allocation7], 4294966272  ;;  %v789_v0 = vld [vmem:[#allocation6 + $0x38] sm:$0xff]  ;;  %v788_v1 = vld [vmem:[#allocation6 + $0x30] sm:$0xff]  ;;  %s703_s1 = sshll.u32 %s1171_s6, 7  ;;  %s790_s30 = sshll.u32 %s1031_s15, 7 }
  0x28   : > { %424 = vmatpush.bf16.msra.mxu0 %v789_v0  ;;  %791 = vmatpush.bf16.msra.mxu1 %v789_v0  ;;  %v787_v2 = vld [vmem:[#allocation6 + $0x28] sm:$0xff]  ;;  %v786_v3 = vld [vmem:[#allocation6 + $0x20] sm:$0xff]  ;;  %v785_v4 = vld [vmem:[#allocation6 + $0x18] sm:$0xff]  ;;  %s1197_s27 = scalar_lea.vmem [#allocation8], %s703_s1  ;;  %s573_s10 = scalar_lea.hbm %s1257_s3, %s790_s30 }
  0x29   : > { %792 = vmatpush.bf16.msra.mxu2 %v789_v0  ;;  %793 = vmatpush.bf16.msra.mxu3 %v789_v0  ;;  %v784_v5 = vld [vmem:[#allocation6 + $0x10] sm:$0xff]  ;;  %v783_v6 = vld [vmem:[#allocation6 + $0x8] sm:$0xff]  ;;  %v782_v7 = vld [vmem:[#allocation6] sm:$0xff]  ;;  %s574_s24 = sshll.u32 %s1197_s27, 4  ;;  %s576_s15 = sshll.u32 %s573_s10, 4  ;;  %s575_s24 = int_to_ptr.vmem [resolvable:$true] %s574_s24  ;;  %s577_s15 = int_to_ptr.hbm [resolvable:$true] %s576_s15 }
  0x2a   : > { %v774_v8 = vld [vmem:[%s1175_s19] sm:$0xff]  ;;  %v776_v9 = vld [vmem:[%s1175_s19 + $0x10] sm:$0xff]  ;;  %v775_v12 = vld [vmem:[%s1175_s19 + $0x8] sm:$0xff]  ;;  %s561_s25 = scalar_lea.sflag [#allocation5], %s1171_s6  ;;  %s967_s26 = sshra.s32 %s577_s15, 4  ;;  %s968_s26 = int_to_ptr.hbm [resolvable:$true] %s967_s26 }
  0x2b   : > { %v778_v10 = vld [vmem:[%s1175_s19 + $0x20] sm:$0xff]  ;;  %v780_v11 = vld [vmem:[%s1175_s19 + $0x30] sm:$0xff]  ;;  %v777_v13 = vld [vmem:[%s1175_s19 + $0x18] sm:$0xff]  ;;  %s969_s28 = scalar_lea.hbm %s968_s26, 128  ;;  %s973_s9 = scalar_lea.hbm %s1257_s3, 256 }
  0x2c   : > { %425 = vmatpush.bf16.msra.mxu0 %v788_v1  ;;  %794 = vmatpush.bf16.msra.mxu1 %v788_v1  ;;  %v779_v14 = vld [vmem:[%s1175_s19 + $0x28] sm:$0xff]  ;;  %v781_v15 = vld [vmem:[%s1175_s19 + $0x38] sm:$0xff]  ;;  %v892_v16 = vld [vmem:[%s1256_s2] ss:$0 sm:$0xff]  ;;  %p970_p1 = scmp.ne.s32.totalorder %s968_s26, %s969_s28  ;;  %p974_p10 = scmp.lt.s32.totalorder %s968_s26, %s1257_s3 }
  0x2d   : > { %795 = vmatpush.bf16.msra.mxu2 %v788_v1  ;;  %796 = vmatpush.bf16.msra.mxu3 %v788_v1  ;;  %p975_p12 = scmp.lt.s32.totalorder %s973_s9, %s969_s28 }
  0x2e   : > { %p971_p4 = pnand %p970_p1, %p1148_p5 }
  0x2f   : > { %p976_p13 = por %p975_p12, %p974_p10 }
  0x30   : > { %426 = vmatpush.bf16.msra.mxu0 %v787_v2  ;;  %797 = vmatpush.bf16.msra.mxu1 %v787_v2  ;;  %p972_p8 = pneg %p971_p4 }
  0x31   : > { %798 = vmatpush.bf16.msra.mxu2 %v787_v2  ;;  %799 = vmatpush.bf16.msra.mxu3 %v787_v2 }
  0x32   : > { %p977_p0 = pnand %p976_p13, %p972_p8 }
  0x34   : > { %427 = vmatpush.bf16.msra.mxu0 %v786_v3  ;;  %800 = vmatpush.bf16.msra.mxu1 %v786_v3 }
  0x35   : > { %801 = vmatpush.bf16.msra.mxu2 %v786_v3  ;;  %802 = vmatpush.bf16.msra.mxu3 %v786_v3 }
  0x38   : > { %428 = vmatpush.bf16.msra.mxu0 %v785_v4  ;;  %803 = vmatpush.bf16.msra.mxu1 %v785_v4 }
  0x39   : > { %804 = vmatpush.bf16.msra.mxu2 %v785_v4  ;;  %805 = vmatpush.bf16.msra.mxu3 %v785_v4 }
  0x3c   : > { %429 = vmatpush.bf16.msra.mxu0 %v784_v5  ;;  %806 = vmatpush.bf16.msra.mxu1 %v784_v5 }
  0x3d   : > { %807 = vmatpush.bf16.msra.mxu2 %v784_v5  ;;  %808 = vmatpush.bf16.msra.mxu3 %v784_v5 }
  0x40   : > { %430 = vmatpush.bf16.msra.mxu0 %v783_v6  ;;  %809 = vmatpush.bf16.msra.mxu1 %v783_v6 }
  0x41   : > { %810 = vmatpush.bf16.msra.mxu2 %v783_v6  ;;  %811 = vmatpush.bf16.msra.mxu3 %v783_v6 }
  0x44   : > { %431 = vmatpush.bf16.msra.mxu0 %v782_v7  ;;  %812 = vmatpush.bf16.msra.mxu1 %v782_v7 }
  0x45   : > { %813 = vmatpush.bf16.msra.mxu2 %v782_v7  ;;  %814 = vmatpush.bf16.msra.mxu3 %v782_v7 }
  0x47   : > { %432 = vmatmul.bf16.vlgmr.msra.gmra.mxu0 %v774_v8  ;;  %442 = vmatmul.bf16.vlgmr.msra.gmra.mxu1 %v776_v9 }
  0x48   : > { %452 = vmatmul.bf16.vlgmr.msra.gmra.mxu2 %v778_v10  ;;  %462 = vmatmul.bf16.vlgmr.msra.gmra.mxu3 %v780_v11 }
  0x57   : > { %437 = vmatmul.bf16.gmra.mxu0 %v775_v12  ;;  %447 = vmatmul.bf16.gmra.mxu1 %v777_v13 }
  0x58   : > { %457 = vmatmul.bf16.gmra.mxu2 %v779_v14  ;;  %467 = vmatmul.bf16.gmra.mxu3 %v781_v15 }
  0xc4   : > { %v433_v17 = vpop.f32.mrf.mxu0  ;;  %v443_v18 = vpop.f32.mrf.mxu1 }
  0xc5   : > { %v528_v19 = vadd.f32 %v892_v16, %v433_v17  ;;  %v532_v20 = vadd.f32 %v892_v16, %v443_v18 }
  0xc7   : > { %544 = vst [vmem:[%s1197_s27] sm:$0xff] %v528_v19 }
  0xc8   : > { %548 = vst [vmem:[%s1197_s27 + $0x20] sm:$0xff] %v532_v20 }
  0xcb   : > { %v453_v21 = vpop.f32.mrf.mxu2  ;;  %v463_v22 = vpop.f32.mrf.mxu3 }
  0xcc   : > { %v536_v23 = vadd.f32 %v892_v16, %v453_v21  ;;  %v540_v24 = vadd.f32 %v892_v16, %v463_v22  ;;  %v435_v25 = vpop.f32.mrf.mxu0  ;;  %v445_v26 = vpop.f32.mrf.mxu1 }
  0xcd   : > { %v529_v27 = vadd.f32 %v892_v16, %v435_v25  ;;  %v533_v28 = vadd.f32 %v892_v16, %v445_v26 }
  0xce   : > { %552 = vst [vmem:[%s1197_s27 + $0x40] sm:$0xff] %v536_v23 }
  0xcf   : > { %556 = vst [vmem:[%s1197_s27 + $0x60] sm:$0xff] %v540_v24 }
  0xd0   : > { %545 = vst [vmem:[%s1197_s27 + $0x8] sm:$0xff] %v529_v27 }
  0xd1   : > { %549 = vst [vmem:[%s1197_s27 + $0x28] sm:$0xff] %v533_v28 }
  0xd3   : > { %v455_v29 = vpop.f32.mrf.mxu2  ;;  %v465_v30 = vpop.f32.mrf.mxu3 }
  0xd4   : > { %v537_v31 = vadd.f32 %v892_v16, %v455_v29  ;;  %v541_v32 = vadd.f32 %v892_v16, %v465_v30  ;;  %v438_v33 = vpop.f32.mrf.mxu0  ;;  %v448_v34 = vpop.f32.mrf.mxu1 }
  0xd5   : > { %v530_v35 = vadd.f32 %v892_v16, %v438_v33  ;;  %v534_v36 = vadd.f32 %v892_v16, %v448_v34 }
  0xd6   : > { %553 = vst [vmem:[%s1197_s27 + $0x48] sm:$0xff] %v537_v31 }
  0xd7   : > { %557 = vst [vmem:[%s1197_s27 + $0x68] sm:$0xff] %v541_v32 }
  0xd8   : > { %546 = vst [vmem:[%s1197_s27 + $0x10] sm:$0xff] %v530_v35 }
  0xd9   : > { %550 = vst [vmem:[%s1197_s27 + $0x30] sm:$0xff] %v534_v36 }
  0xdb   : > { %v458_v37 = vpop.f32.mrf.mxu2  ;;  %v468_v38 = vpop.f32.mrf.mxu3 }
  0xdc   : > { %v538_v39 = vadd.f32 %v892_v16, %v458_v37  ;;  %v542_v40 = vadd.f32 %v892_v16, %v468_v38  ;;  %v440_v41 = vpop.f32.mrf.mxu0  ;;  %v450_v42 = vpop.f32.mrf.mxu1 }
  0xdd   : > { %v531_v43 = vadd.f32 %v892_v16, %v440_v41  ;;  %v535_v44 = vadd.f32 %v892_v16, %v450_v42 }
  0xde   : > { %554 = vst [vmem:[%s1197_s27 + $0x50] sm:$0xff] %v538_v39 }
  0xdf   : > { %558 = vst [vmem:[%s1197_s27 + $0x70] sm:$0xff] %v542_v40 }
  0xe0   : > { %547 = vst [vmem:[%s1197_s27 + $0x18] sm:$0xff] %v531_v43 }
  0xe1   : > { %551 = vst [vmem:[%s1197_s27 + $0x38] sm:$0xff] %v535_v44 }
  0xe3   : > { %v460_v45 = vpop.f32.mrf.mxu2  ;;  %v470_v46 = vpop.f32.mrf.mxu3 }
  0xe4   : > { %v539_v47 = vadd.f32 %v892_v16, %v460_v45  ;;  %v543_v48 = vadd.f32 %v892_v16, %v470_v46 }
  0xe6   : > { %555 = vst [vmem:[%s1197_s27 + $0x58] sm:$0xff] %v539_v47 }
  0xe7   : > { %559 = vst [vmem:[%s1197_s27 + $0x78] sm:$0xff] %v543_v48 }
  0xe8   : > { %980 = shalt.err (!%p977_p0)
}
  0xe9   : > { %s1044_s6 = smov 128   ;;  %s1045_s1 = smov 8  }
  0xea   : > { %821 = dma.vmem_to_hbm [thread:$0]  (%p1148_p5), %s575_s24, 2048, %s577_s15, %s561_s25, %s1044_s6, %s1044_s6, %s1045_s1  }
  0xeb PF: > { %s591_s20 = sand.u32 1, %s1019_s12   ;;  %p832_p3 = pnand %p696_p11, %p1115_p6 }
  0xec   : > { %s592_s22 = scalar_lea.sflag [#allocation5], %s591_s20 }
  0xed   : > { %p833_p7 = pneg %p832_p3 }
  0xef   : > { %1014 = dma.done.wait (%p833_p7), %s592_s22, 2048  }
  0xf0   : > { %1016 = vsyncadd (%p833_p7), %s592_s22, 4294965248  ;;  %s20_s17 = sadd.s32 1, %s1039_s17   ;;  %s1269_s12 = smov %s1023_s13 }
  0xf1   : > { %p17_p9 = scmp.ge.s32.totalorder %s20_s17, 4   ;;  %s1270_s13 = smov %s1027_s14 }
  0xf2   : > { %s1271_s14 = smov %s1157_s18  ;;  %s1272_s15 = smov %s1035_s16 }
  0xf3   : > { %s1273_s16 = smov %s1275_s5  ;;  %19 = sbr.rel (!%p17_p9) target bundleno = 9 (0x9), region = 93 }
  0xf8   :  { %598 = vsyncpa [#allocation4], 1 }
  0xf9   :  { %600 = vsyncpa [#allocation4 + $0x1], 1 }
  0xfa   :  { %601 = vsyncpa [#allocation7], 1 }
  0xfb   :  { %602 = vsyncpa [#allocation5], 1 }
  0xfc   :  { %604 = vsyncpa [#allocation5 + $0x1], 1 }

</bundles_post_ra>
